<compile_context>
chip_gen: v7x
topology: tpu7x:2x2x1
jax: 0.10.0
libtpu: 0.0.40
codegen_flags: <defaults>
</compile_context>

<pallas_src>
import functools

import jax
import jax.numpy as jnp
from jax.experimental import pallas as pl
from jax.experimental.pallas import tpu as pltpu

OBS_DIM = 24       # BipedalWalker-v3 observation_space.shape = (24,)
ACT_DIM = 4        # BipedalWalker-v3 action_space.shape = (4,)
FC1_DIMS = 1024
FC2_DIMS = 512
PAD_ACT = 128      # lane-dense padded width for the fc3 output
LOG_STD_MIN = -20.0
LOG_STD_MAX = 2.0
MAX_TILE_B = 256   # multiple of 256 (v6e/v7x MXU) and 128 (v5e MXU)


def _round_up(x, m):
    return (x + m - 1) // m * m


def actor_kernel(x_ref, w1_ref, b1_ref, w2_ref, b2_ref, w3_ref, b3_ref, mu_ref):
    # x tile: (TILE_B, 24) f32 -> bf16 for the MXU; weights are already bf16.
    x = x_ref[...].astype(jnp.bfloat16)

    h1 = jnp.dot(x, w1_ref[...], preferred_element_type=jnp.float32) + b1_ref[...]
    h1 = jnp.maximum(h1, 0.0).astype(jnp.bfloat16)                 # relu(fc1)

    h2 = jnp.dot(h1, w2_ref[...], preferred_element_type=jnp.float32) + b2_ref[...]
    h2 = jnp.maximum(h2, 0.0).astype(jnp.bfloat16)                 # relu(fc2)

    h3 = jnp.dot(h2, w3_ref[...], preferred_element_type=jnp.float32) + b3_ref[...]
    mu_ref[...] = jnp.tanh(h3).astype(mu_ref.dtype)                # tanh(fc3), lane-dense (TILE_B, 128)


@jax.jit
def actor_forward(x, w1, b1, w2, b2, w3, b3, log_std):
    """x: (B, 24) f32; w*: bf16 (in, out); b*: f32 (1, out); log_std: f32 (1, 4)."""
    B = x.shape[0]
    tile_b = min(MAX_TILE_B, _round_up(B, 8))
    b_pad = _round_up(B, tile_b)
    grid = (b_pad // tile_b,)

    x_p = jnp.zeros((b_pad, OBS_DIM), jnp.float32).at[:B].set(x.astype(jnp.float32))
    # Lane-dense final layer: pad N from 4 -> 128 with zeros (sliced off below).
    w3_p = jnp.zeros((FC2_DIMS, PAD_ACT), w3.dtype).at[:, :ACT_DIM].set(w3)
    b3_p = jnp.zeros((1, PAD_ACT), jnp.float32).at[:, :ACT_DIM].set(b3)

    const = lambda i: (0, 0)   # weights/biases: same block every step -> resident in VMEM
    cost = pl.CostEstimate(
        flops=2 * b_pad * (OBS_DIM * FC1_DIMS + FC1_DIMS * FC2_DIMS + FC2_DIMS * PAD_ACT),
        transcendentals=b_pad * PAD_ACT,
        bytes_accessed=(x_p.size * 4
                        + (w1.size + w2.size + w3_p.size) * 2
                        + (b1.size + b2.size + b3_p.size) * 4
                        + b_pad * PAD_ACT * 4),
    )

    mu_pad = pl.pallas_call(
        actor_kernel,
        out_shape=jax.ShapeDtypeStruct((b_pad, PAD_ACT), jnp.float32),
        grid=grid,
        in_specs=[
            pl.BlockSpec((tile_b, OBS_DIM), lambda i: (i, 0)),     # x: batch-tiled
            pl.BlockSpec((OBS_DIM, FC1_DIMS), const),              # w1 (bf16)
            pl.BlockSpec((1, FC1_DIMS), const),                    # b1
            pl.BlockSpec((FC1_DIMS, FC2_DIMS), const),             # w2 (bf16)
            pl.BlockSpec((1, FC2_DIMS), const),                    # b2
            pl.BlockSpec((FC2_DIMS, PAD_ACT), const),              # w3 padded (bf16)
            pl.BlockSpec((1, PAD_ACT), const),                     # b3 padded
        ],
        out_specs=pl.BlockSpec((tile_b, PAD_ACT), lambda i: (i, 0)),
        compiler_params=pltpu.CompilerParams(
            dimension_semantics=("parallel",),                     # shard batch tiles across TCs (v7x)
        ),
        cost_estimate=cost,
    )(x_p, w1, b1, w2, b2, w3_p, b3_p)

    mu = mu_pad[:B, :ACT_DIM]
    # std is batch-independent: compute once in the wrapper and broadcast.
    std = jnp.broadcast_to(
        jnp.exp(jnp.clip(log_std, LOG_STD_MIN, LOG_STD_MAX)), mu.shape
    ).astype(jnp.float32)
    return mu, std


def init_params(key):
    """PyTorch nn.Linear-style init (uniform +/- 1/sqrt(fan_in)).
    Weights are stored (in_features, out_features) in bfloat16 (halves weight DMA);
    biases and log_std stay float32."""
    k1, k2, k3, k4, k5, k6 = jax.random.split(key, 6)

    def lin(kw, kb, fan_in, fan_out):
        bound = 1.0 / jnp.sqrt(float(fan_in))
        w = jax.random.uniform(kw, (fan_in, fan_out), jnp.float32, -bound, bound)
        b = jax.random.uniform(kb, (1, fan_out), jnp.float32, -bound, bound)
        return w.astype(jnp.bfloat16), b

    w1, b1 = lin(k1, k2, OBS_DIM, FC1_DIMS)
    w2, b2 = lin(k3, k4, FC1_DIMS, FC2_DIMS)
    w3, b3 = lin(k5, k6, FC2_DIMS, ACT_DIM)
    log_std = jnp.ones((1, ACT_DIM), jnp.float32) * 0.5   # nn.Parameter(ones * std)
    return w1, b1, w2, b2, w3, b3, log_std


def _reference(x, w1, b1, w2, b2, w3, b3, log_std):
    """Pure-JAX reference mirroring the kernel's bf16 weight / activation casts."""
    h1 = jnp.maximum(
        jnp.dot(x.astype(jnp.bfloat16), w1, preferred_element_type=jnp.float32) + b1, 0.0)
    h2 = jnp.maximum(
        jnp.dot(h1.astype(jnp.bfloat16), w2, preferred_element_type=jnp.float32) + b2, 0.0)
    mu = jnp.tanh(
        jnp.dot(h2.astype(jnp.bfloat16), w3, preferred_element_type=jnp.float32) + b3)
    std = jnp.broadcast_to(jnp.exp(jnp.clip(log_std, LOG_STD_MIN, LOG_STD_MAX)), mu.shape)
    return mu, std


if __name__ == "__main__":
    key = jax.random.PRNGKey(0)
    pkey, xkey1, xkey2 = jax.random.split(key, 3)
    params = init_params(pkey)

    # Small RL-inference batch (single grid step).
    x_small = jax.random.normal(xkey1, (8, OBS_DIM), jnp.float32)
    mu_s, std_s = actor_forward(x_small, *params)
    jax.block_until_ready((mu_s, std_s))
    mu_s_ref, std_s_ref = _reference(x_small, *params)
    assert mu_s.shape == (8, ACT_DIM) and std_s.shape == (8, ACT_DIM)
    assert jnp.allclose(mu_s, mu_s_ref, atol=2e-3), "mu mismatch (small batch)"
    assert jnp.allclose(std_s, std_s_ref, atol=1e-6), "std mismatch (small batch)"

    # Larger, non-multiple batch to exercise the tiled (pipelined / parallel) path + padding.
    x_big = jax.random.normal(xkey2, (300, OBS_DIM), jnp.float32)
    mu_b, std_b = actor_forward(x_big, *params)
    jax.block_until_ready((mu_b, std_b))
    mu_b_ref, std_b_ref = _reference(x_big, *params)
    assert mu_b.shape == (300, ACT_DIM) and std_b.shape == (300, ACT_DIM)
    assert jnp.allclose(mu_b, mu_b_ref, atol=2e-3), "mu mismatch (tiled batch)"
    assert jnp.allclose(std_b, std_b_ref, atol=1e-6), "std mismatch (tiled batch)"

    print("KERNEL_OK")
</pallas_src>

<mosaic_0001>
module attributes {stable_mosaic.version = 11 : i64} {
  func.func @actor_kernel(%arg0: i32, %arg1: memref<8x24xf32, #tpu.memory_space<vmem>>, %arg2: memref<24x1024xbf16, #tpu.memory_space<vmem>>, %arg3: memref<1x1024xf32, #tpu.memory_space<vmem>>, %arg4: memref<1024x512xbf16, #tpu.memory_space<vmem>>, %arg5: memref<1x512xf32, #tpu.memory_space<vmem>>, %arg6: memref<512x128xbf16, #tpu.memory_space<vmem>>, %arg7: memref<1x128xf32, #tpu.memory_space<vmem>>, %arg8: memref<8x128xf32, #tpu.memory_space<vmem>>) attributes {dimension_semantics = [#tpu.dimension_semantics<parallel>], iteration_bounds = array<i64: 1>, scalar_prefetch = 0 : i64, scratch_operands = 0 : i64, tpu.core_type = #tpu.core_type<tc>, window_params = [{transform_indices = @transform_0, window_bounds = array<i64: 8, 24>}, {pipeline_mode = #tpu.pipeline_mode<synchronous>, transform_indices = @transform_1, window_bounds = array<i64: 24, 1024>}, {pipeline_mode = #tpu.pipeline_mode<synchronous>, transform_indices = @transform_2, window_bounds = array<i64: 1, 1024>}, {pipeline_mode = #tpu.pipeline_mode<synchronous>, transform_indices = @transform_3, window_bounds = array<i64: 1024, 512>}, {pipeline_mode = #tpu.pipeline_mode<synchronous>, transform_indices = @transform_4, window_bounds = array<i64: 1, 512>}, {pipeline_mode = #tpu.pipeline_mode<synchronous>, transform_indices = @transform_5, window_bounds = array<i64: 512, 128>}, {pipeline_mode = #tpu.pipeline_mode<synchronous>, transform_indices = @transform_6, window_bounds = array<i64: 1, 128>}, {transform_indices = @transform_7, window_bounds = array<i64: 8, 128>}]} {
    %c0 = arith.constant 0 : index
    %c0_0 = arith.constant 0 : index
    %0 = vector.load %arg1[%c0, %c0_0] : memref<8x24xf32, #tpu.memory_space<vmem>>, vector<8x24xf32>
    %1 = arith.truncf %0 : vector<8x24xf32> to vector<8x24xbf16>
    %c0_1 = arith.constant 0 : index
    %c0_2 = arith.constant 0 : index
    %2 = vector.load %arg2[%c0_1, %c0_2] : memref<24x1024xbf16, #tpu.memory_space<vmem>>, vector<24x1024xbf16>
    %cst = arith.constant dense<0.000000e+00> : vector<8x1024xf32>
    %3 = tpu.matmul %1, %2, %cst {dimension_numbers = #tpu.dot_dimension_numbers<[1], [0], [0], [1], [0, 0, 1, 1], [], []>} : vector<8x24xbf16>, vector<24x1024xbf16>, vector<8x1024xf32> -> vector<8x1024xf32>
    %c0_3 = arith.constant 0 : index
    %c0_4 = arith.constant 0 : index
    %4 = vector.load %arg3[%c0_3, %c0_4] : memref<1x1024xf32, #tpu.memory_space<vmem>>, vector<1x1024xf32>
    %5 = vector.broadcast %4 : vector<1x1024xf32> to vector<8x1024xf32>
    %6 = arith.addf %3, %5 : vector<8x1024xf32>
    %cst_5 = arith.constant 0.000000e+00 : f32
    %7 = vector.broadcast %cst_5 : f32 to vector<8x1024xf32>
    %8 = arith.maximumf %6, %7 : vector<8x1024xf32>
    %9 = arith.truncf %8 : vector<8x1024xf32> to vector<8x1024xbf16>
    %c0_6 = arith.constant 0 : index
    %c0_7 = arith.constant 0 : index
    %10 = vector.load %arg4[%c0_6, %c0_7] : memref<1024x512xbf16, #tpu.memory_space<vmem>>, vector<1024x512xbf16>
    %cst_8 = arith.constant dense<0.000000e+00> : vector<8x512xf32>
    %11 = tpu.matmul %9, %10, %cst_8 {dimension_numbers = #tpu.dot_dimension_numbers<[1], [0], [0], [1], [0, 0, 1, 1], [], []>} : vector<8x1024xbf16>, vector<1024x512xbf16>, vector<8x512xf32> -> vector<8x512xf32>
    %c0_9 = arith.constant 0 : index
    %c0_10 = arith.constant 0 : index
    %12 = vector.load %arg5[%c0_9, %c0_10] : memref<1x512xf32, #tpu.memory_space<vmem>>, vector<1x512xf32>
    %13 = vector.broadcast %12 : vector<1x512xf32> to vector<8x512xf32>
    %14 = arith.addf %11, %13 : vector<8x512xf32>
    %cst_11 = arith.constant 0.000000e+00 : f32
    %15 = vector.broadcast %cst_11 : f32 to vector<8x512xf32>
    %16 = arith.maximumf %14, %15 : vector<8x512xf32>
    %17 = arith.truncf %16 : vector<8x512xf32> to vector<8x512xbf16>
    %c0_12 = arith.constant 0 : index
    %c0_13 = arith.constant 0 : index
    %18 = vector.load %arg6[%c0_12, %c0_13] : memref<512x128xbf16, #tpu.memory_space<vmem>>, vector<512x128xbf16>
    %cst_14 = arith.constant dense<0.000000e+00> : vector<8x128xf32>
    %19 = tpu.matmul %17, %18, %cst_14 {dimension_numbers = #tpu.dot_dimension_numbers<[1], [0], [0], [1], [0, 0, 1, 1], [], []>} : vector<8x512xbf16>, vector<512x128xbf16>, vector<8x128xf32> -> vector<8x128xf32>
    %c0_15 = arith.constant 0 : index
    %c0_16 = arith.constant 0 : index
    %20 = vector.load %arg7[%c0_15, %c0_16] : memref<1x128xf32, #tpu.memory_space<vmem>>, vector<1x128xf32>
    %21 = vector.broadcast %20 : vector<1x128xf32> to vector<8x128xf32>
    %22 = arith.addf %19, %21 : vector<8x128xf32>
    %23 = math.tanh %22 : vector<8x128xf32>
    %c0_17 = arith.constant 0 : index
    %c0_18 = arith.constant 0 : index
    %24 = vector.load %arg8[%c0_17, %c0_18] : memref<8x128xf32, #tpu.memory_space<vmem>>, vector<8x128xf32>
    tpu.vector_store %arg8[%c0_17, %c0_18], %23 {strides = array<i32>} : memref<8x128xf32, #tpu.memory_space<vmem>>, vector<8x128xf32>,
    return
  }
  func.func @transform_0(%arg0: i32) -> (i32, i32) {
    %c0_i32 = arith.constant 0 : i32
    %c0_i32_0 = arith.constant 0 : i32
    return %arg0, %c0_i32 : i32, i32
  }
  func.func @transform_1(%arg0: i32) -> (i32, i32) {
    %c0_i32 = arith.constant 0 : i32
    %c0_i32_0 = arith.constant 0 : i32
    %c0_i32_1 = arith.constant 0 : i32
    return %c0_i32, %c0_i32_0 : i32, i32
  }
  func.func @transform_2(%arg0: i32) -> (i32, i32) {
    %c0_i32 = arith.constant 0 : i32
    %c0_i32_0 = arith.constant 0 : i32
    %c0_i32_1 = arith.constant 0 : i32
    return %c0_i32, %c0_i32_0 : i32, i32
  }
  func.func @transform_3(%arg0: i32) -> (i32, i32) {
    %c0_i32 = arith.constant 0 : i32
    %c0_i32_0 = arith.constant 0 : i32
    %c0_i32_1 = arith.constant 0 : i32
    return %c0_i32, %c0_i32_0 : i32, i32
  }
  func.func @transform_4(%arg0: i32) -> (i32, i32) {
    %c0_i32 = arith.constant 0 : i32
    %c0_i32_0 = arith.constant 0 : i32
    %c0_i32_1 = arith.constant 0 : i32
    return %c0_i32, %c0_i32_0 : i32, i32
  }
  func.func @transform_5(%arg0: i32) -> (i32, i32) {
    %c0_i32 = arith.constant 0 : i32
    %c0_i32_0 = arith.constant 0 : i32
    %c0_i32_1 = arith.constant 0 : i32
    return %c0_i32, %c0_i32_0 : i32, i32
  }
  func.func @transform_6(%arg0: i32) -> (i32, i32) {
    %c0_i32 = arith.constant 0 : i32
    %c0_i32_0 = arith.constant 0 : i32
    %c0_i32_1 = arith.constant 0 : i32
    return %c0_i32, %c0_i32_0 : i32, i32
  }
  func.func @transform_7(%arg0: i32) -> (i32, i32) {
    %c0_i32 = arith.constant 0 : i32
    %c0_i32_0 = arith.constant 0 : i32
    return %arg0, %c0_i32 : i32, i32
  }
}

</mosaic_0001>

<bundles_post_ra>
// kernel: actor_forward.1
= control target key start
LH: loop header
LB: loop body
LE: loop exit
PB: predicated region body
PF: predicated region fallthrough
CT: control target
= control target key end

     0   :  { %12 = vsyncpa [#allocation3], 0  ;;  %s3449_s24 = smov [#allocation2]   ;;  %s3715_s0 = inlined_call_operand.vmem [shape: f32[8,24], index: 0, kind: input, shape index: {}]   ;;  %s3716_s1 = inlined_call_operand.vmem [shape: bf16[24,1024], index: 1, kind: input, shape index: {}]   ;;  %s3717_s2 = inlined_call_operand.vmem [shape: f32[1,1024], index: 2, kind: input, shape index: {}]   ;;  %s3718_s3 = inlined_call_operand.hbm [shape: bf16[1024,512], index: 3, kind: input, shape index: {}]   ;;  %s3719_s4 = inlined_call_operand.vmem [shape: f32[1,512], index: 4, kind: input, shape index: {}]   ;;  %s3720_s5 = inlined_call_operand.vmem [shape: bf16[512,128], index: 5, kind: input, shape index: {}]   ;;  %s3721_s6 = inlined_call_operand.vmem [shape: f32[1,128], index: 6, kind: input, shape index: {}]   ;;  %s3722_s7 = inlined_call_operand.vmem [shape: f32[8,128], index: 7, kind: output, shape index: {}]  }
   0x1   :  { %s24_s25 = sshll.u32 %s3449_s24, 4  ;;  %s3425_s28 = scalar_lea.hbm %s3718_s3, 32768  ;;  %s25_s25 = int_to_ptr.vmem [resolvable:$true] %s24_s25 }
   0x2   :  { %p3426_p0 = scmp.ne.s32.totalorder %s3718_s3, %s3425_s28  ;;  %p3429_p1 = scmp.lt.u32.totalorder %s3425_s28, %s3718_s3 }
   0x4   :  { %p3431_p2 = pnand %p3429_p1, %p3426_p0 }
   0x6   :  { %3434 = shalt.err (!%p3431_p2)
}
   0x7   :  { %s3435_s10 = scalar_lea.vmem %s25_s25, 32768  ;;  %p3440_p4 = scmp.lt.s32.totalorder %s25_s25, %s25_s25 }
   0x8   :  { %p3436_p3 = scmp.ne.s32.totalorder %s25_s25, %s3435_s10  ;;  %p3441_p5 = scmp.lt.s32.totalorder %s3435_s10, %s3435_s10 }
   0xa   :  { %p3442_p6 = por %p3441_p5, %p3440_p4 }
   0xc   :  { %p3443_p7 = pnand %p3442_p6, %p3436_p3 }
   0xe   :  { %3446 = shalt.err (!%p3443_p7)
}
   0xf   :  { %s3450_s11 = smov 256   ;;  %s3451_s12 = smov 16  }
  0x10   :  { %30 = dma.hbm_to_vmem [thread:$0]  %s3718_s3, 32768, %s25_s25, [#allocation3], %s3450_s11, %s3450_s11, %s3451_s12  }
  0x11   :  { %3447 = dma.done.wait [#allocation3], 32768  }
  0x12   :  { %3448 = vsyncadd [#allocation3], 4294934528  ;;  %v3452_v0 = vmov 0   ;;  %v43_v1 = vld [vmem:[%s3716_s1] sm:$0xff]  ;;  %v44_v8 = vld [vmem:[%s3716_s1 + $0x8] sm:$0xff]  ;;  %vm161_vm0 = vcmask 1043456  }
  0x13   :  { %218 = vmatprep.mubr.bf16.mxu0 %v3452_v0  ;;  %259 = vmatprep.mubr.bf16.mxu1 %v3452_v0  ;;  %v47_v2 = vld [vmem:[%s3716_s1 + $0x20] sm:$0xff]  ;;  %v48_v9 = vld [vmem:[%s3716_s1 + $0x28] sm:$0xff]  ;;  %v45_v13 = vld [vmem:[%s3716_s1 + $0x10] sm:$0xff]  ;;  %vm157_vm1 = vcmask 195584  }
  0x14   :  { %v51_v3 = vld [vmem:[%s3716_s1 + $0x40] sm:$0xff]  ;;  %v2611_v4 = vcombine.high %v43_v1, %v47_v2  ;;  %v2610_v5 = vcombine.low %v43_v1, %v47_v2  ;;  %v2613_v10 = vcombine.high %v44_v8, %v48_v9  ;;  %v2612_v11 = vcombine.low %v44_v8, %v48_v9  ;;  %v52_v12 = vld [vmem:[%s3716_s1 + $0x48] sm:$0xff]  ;;  %v49_v14 = vld [vmem:[%s3716_s1 + $0x30] sm:$0xff] }
  0x15   :  { %v2619_v6 = vcombine.high %v51_v3, %v51_v3  ;;  %v2618_v7 = vcombine.low %v51_v3, %v51_v3  ;;  %v2621_v15 = vcombine.high %v52_v12, %v52_v12  ;;  %v2620_v16 = vcombine.low %v52_v12, %v52_v12  ;;  %v46_v17 = vld [vmem:[%s3716_s1 + $0x18] sm:$0xff]  ;;  %v41_v19 = vld [vmem:[%s3715_s0] sm:$0xff]  ;;  %v53_v23 = vld [vmem:[%s3716_s1 + $0x50] sm:$0xff] }
  0x16   :  { %186 = vmatprep.subr.bf16.mxu0 %v2611_v4  ;;  %v50_v18 = vld [vmem:[%s3716_s1 + $0x38] sm:$0xff]  ;;  %227 = vmatprep.subr.bf16.mxu1 %v2613_v10  ;;  %v2615_v21 = vcombine.high %v45_v13, %v49_v14  ;;  %v42_v25 = vpack.c.bf16 %v41_v19, %v41_v19  ;;  %v2614_v26 = vcombine.low %v45_v13, %v49_v14  ;;  %v3009_v34 = vld [vmem:[#allocation2 + $0x4] ss:$16 sps:$4 sm:$0xff]   ;;  %v3007_v37 = vld [vmem:[#allocation2] ss:$16 sps:$4 sm:$0xff]  }
  0x17   :  { %187 = vmatpush1.bf16.msra.mxu0 %v2610_v5  ;;  %v163_v20 = vsel %vm161_vm0, %v2618_v7, 0  ;;  %228 = vmatpush1.bf16.msra.mxu1 %v2612_v11  ;;  %v169_v22 = vsel %vm161_vm0, %v2620_v16, 0  ;;  %v2617_v24 = vcombine.high %v46_v17, %v50_v18  ;;  %v54_v27 = vld [vmem:[%s3716_s1 + $0x58] sm:$0xff]  ;;  %v2623_v28 = vcombine.high %v53_v23, %v53_v23  ;;  %v3015_v38 = vld [vmem:[#allocation2 + $0x24] ss:$16 sps:$4 sm:$0xff]  }
  0x18   :  { %2626 = vmatprep.subr.msk.bf16.mxu0 %vm161_vm0, %v2619_v6  ;;  %2628 = vmatprep.subr.msk.bf16.mxu1 %vm161_vm0, %v2621_v15  ;;  %v2622_v29 = vcombine.low %v53_v23, %v53_v23  ;;  %v2616_v30 = vcombine.low %v46_v17, %v50_v18  ;;  %v2625_v31 = vcombine.high %v54_v27, %v54_v27  ;;  %v3012_v36 = vld [vmem:[#allocation2 + $0xc] ss:$16 sps:$4 sm:$0xff]   ;;  %v3010_v39 = vld [vmem:[#allocation2 + $0x8] ss:$16 sps:$4 sm:$0xff]   ;;  %v3013_v41 = vld [vmem:[#allocation2 + $0x20] ss:$16 sps:$4 sm:$0xff]  }
  0x19   :  { %v2624_v32 = vcombine.low %v54_v27, %v54_v27  ;;  %v3018_v40 = vld [vmem:[#allocation2 + $0x2c] ss:$16 sps:$4 sm:$0xff]   ;;  %v3021_v42 = vld [vmem:[#allocation2 + $0x44] ss:$16 sps:$4 sm:$0xff]   ;;  %v3016_v43 = vld [vmem:[#allocation2 + $0x28] ss:$16 sps:$4 sm:$0xff]  }
  0x1a   :  { %v175_v33 = vsel %vm161_vm0, %v2622_v29, 0  ;;  %v3024_v44 = vld [vmem:[#allocation2 + $0x4c] ss:$16 sps:$4 sm:$0xff]   ;;  %v3019_v45 = vld [vmem:[#allocation2 + $0x40] ss:$16 sps:$4 sm:$0xff]  }
  0x1b   :  { %189 = vmatpush1.bf16.msra.mxu0 %v163_v20  ;;  %230 = vmatpush1.bf16.msra.mxu1 %v169_v22  ;;  %v181_v35 = vsel %vm161_vm0, %v2624_v32, 0  ;;  %v3027_v46 = vld [vmem:[#allocation2 + $0x64] ss:$16 sps:$4 sm:$0xff]   ;;  %v3022_v47 = vld [vmem:[#allocation2 + $0x48] ss:$16 sps:$4 sm:$0xff]  }
  0x1c   :  { %268 = vmatprep.subr.bf16.mxu0 %v2615_v21  ;;  %309 = vmatprep.subr.bf16.mxu1 %v2617_v24  ;;  %v3030_v48 = vld [vmem:[#allocation2 + $0x6c] ss:$16 sps:$4 sm:$0xff]   ;;  %v3025_v49 = vld [vmem:[#allocation2 + $0x60] ss:$16 sps:$4 sm:$0xff]   ;;  %v3033_v50 = vld [vmem:[#allocation2 + $0x84] ss:$16 sps:$4 sm:$0xff]  }
  0x1d   :  { %v3028_v51 = vld [vmem:[#allocation2 + $0x68] ss:$16 sps:$4 sm:$0xff]   ;;  %v3036_v52 = vld [vmem:[#allocation2 + $0x8c] ss:$16 sps:$4 sm:$0xff]   ;;  %v3031_v53 = vld [vmem:[#allocation2 + $0x80] ss:$16 sps:$4 sm:$0xff]  }
  0x1e   :  { %2627 = vmatmul.mubr.msk.bf16.vlgmr.msra.gmra.mrb[0].mxu0 %vm157_vm1, %v42_v25  ;;  %2629 = vmatmul.mubr.msk.bf16.vlgmr.msra.gmra.mrb[0].mxu1 %vm157_vm1, %v42_v25  ;;  %v3039_v54 = vld [vmem:[#allocation2 + $0xa4] ss:$16 sps:$4 sm:$0xff]   ;;  %v3034_v55 = vld [vmem:[#allocation2 + $0x88] ss:$16 sps:$4 sm:$0xff]   ;;  %v3042_v56 = vld [vmem:[#allocation2 + $0xac] ss:$16 sps:$4 sm:$0xff]  }
  0x1f   :  { %269 = vmatpush1.bf16.msra.mxu0 %v2614_v26  ;;  %300 = vmatprep.mubr.bf16.mxu0 %v3452_v0  ;;  %v3037_v57 = vld [vmem:[#allocation2 + $0xa0] ss:$16 sps:$4 sm:$0xff]   ;;  %v3045_v58 = vld [vmem:[#allocation2 + $0xc4] ss:$16 sps:$4 sm:$0xff]   ;;  %v3040_v59 = vld [vmem:[#allocation2 + $0xa8] ss:$16 sps:$4 sm:$0xff]  }
  0x20   :  { %2630 = vmatprep.subr.msk.bf16.mxu0 %vm161_vm0, %v2623_v28  ;;  %310 = vmatpush1.bf16.msra.mxu1 %v2616_v30  ;;  %v3048_v60 = vld [vmem:[#allocation2 + $0xcc] ss:$16 sps:$4 sm:$0xff]   ;;  %v3043_v61 = vld [vmem:[#allocation2 + $0xc0] ss:$16 sps:$4 sm:$0xff]   ;;  %v3046_v62 = vld [vmem:[#allocation2 + $0xc8] ss:$16 sps:$4 sm:$0xff]  }
  0x21   :  { %341 = vmatprep.mubr.bf16.mxu1 %v3452_v0  ;;  %2632 = vmatprep.subr.msk.bf16.mxu1 %vm161_vm0, %v2625_v31  ;;  %v3051_v63 = vld [vmem:[#allocation2 + $0xe4] ss:$16 sps:$4 sm:$0xff]   ;;  %v3054_v0 = vld [vmem:[#allocation2 + $0xec] ss:$16 sps:$4 sm:$0xff]   ;;  %v3049_v1 = vld [vmem:[#allocation2 + $0xe0] ss:$16 sps:$4 sm:$0xff]  }
  0x22   :  { %v3057_v2 = vld [vmem:[#allocation2 + $0x104] ss:$16 sps:$4 sm:$0xff]   ;;  %v3052_v3 = vld [vmem:[#allocation2 + $0xe8] ss:$16 sps:$4 sm:$0xff]   ;;  %v3060_v4 = vld [vmem:[#allocation2 + $0x10c] ss:$16 sps:$4 sm:$0xff]  }
  0x23   :  { %271 = vmatpush1.bf16.msra.mxu0 %v175_v33  ;;  %v3055_v5 = vld [vmem:[#allocation2 + $0x100] ss:$16 sps:$4 sm:$0xff]   ;;  %v3063_v6 = vld [vmem:[#allocation2 + $0x124] ss:$16 sps:$4 sm:$0xff]   ;;  %v3058_v7 = vld [vmem:[#allocation2 + $0x108] ss:$16 sps:$4 sm:$0xff]  }
  0x24   :  { %1924 = vmatprep.subr.bf16.mxu0 %v3009_v34  ;;  %312 = vmatpush1.bf16.msra.mxu1 %v181_v35  ;;  %v3066_v8 = vld [vmem:[#allocation2 + $0x12c] ss:$16 sps:$4 sm:$0xff]   ;;  %v3061_v9 = vld [vmem:[#allocation2 + $0x120] ss:$16 sps:$4 sm:$0xff]   ;;  %v3069_v10 = vld [vmem:[#allocation2 + $0x144] ss:$16 sps:$4 sm:$0xff]  }
  0x25   :  { %2088 = vmatprep.subr.bf16.mxu1 %v3012_v36  ;;  %v3064_v11 = vld [vmem:[#allocation2 + $0x128] ss:$16 sps:$4 sm:$0xff]   ;;  %v3072_v12 = vld [vmem:[#allocation2 + $0x14c] ss:$16 sps:$4 sm:$0xff]   ;;  %v3067_v13 = vld [vmem:[#allocation2 + $0x140] ss:$16 sps:$4 sm:$0xff]  }
  0x26   :  { %2631 = vmatmul.mubr.msk.bf16.vlgmr.msra.gmra.mrb[4].mxu0 %vm157_vm1, %v42_v25  ;;  %v3075_v14 = vld [vmem:[#allocation2 + $0x164] ss:$16 sps:$4 sm:$0xff]   ;;  %v3070_v15 = vld [vmem:[#allocation2 + $0x148] ss:$16 sps:$4 sm:$0xff]   ;;  %v3078_v16 = vld [vmem:[#allocation2 + $0x16c] ss:$16 sps:$4 sm:$0xff]  }
  0x27   :  { %1925 = vmatpush1.bf16.msra.mxu0 %v3007_v37  ;;  %2633 = vmatmul.mubr.msk.bf16.vlgmr.msra.gmra.mrb[4].mxu1 %vm157_vm1, %v42_v25  ;;  %v3073_v17 = vld [vmem:[#allocation2 + $0x160] ss:$16 sps:$4 sm:$0xff]   ;;  %v3081_v18 = vld [vmem:[#allocation2 + $0x184] ss:$16 sps:$4 sm:$0xff]   ;;  %v3076_v19 = vld [vmem:[#allocation2 + $0x168] ss:$16 sps:$4 sm:$0xff]   ;;  %v57_v37 = vlaneseq }
  0x28   :  { %1926 = vmatprep.subr.bf16.mxu0 %v3015_v38  ;;  %2089 = vmatpush1.bf16.msra.mxu1 %v3010_v39  ;;  %v3084_v20 = vld [vmem:[#allocation2 + $0x18c] ss:$16 sps:$4 sm:$0xff]   ;;  %v3079_v21 = vld [vmem:[#allocation2 + $0x180] ss:$16 sps:$4 sm:$0xff]   ;;  %v3087_v22 = vld [vmem:[#allocation2 + $0x1a4] ss:$16 sps:$4 sm:$0xff]  }
  0x29   :  { %2090 = vmatprep.subr.bf16.mxu1 %v3018_v40  ;;  %v3082_v23 = vld [vmem:[#allocation2 + $0x188] ss:$16 sps:$4 sm:$0xff]   ;;  %v3090_v24 = vld [vmem:[#allocation2 + $0x1ac] ss:$16 sps:$4 sm:$0xff]   ;;  %v3085_v25 = vld [vmem:[#allocation2 + $0x1a0] ss:$16 sps:$4 sm:$0xff]  }
  0x2a   :  { %v3088_v26 = vld [vmem:[#allocation2 + $0x1a8] ss:$16 sps:$4 sm:$0xff]   ;;  %v3093_v27 = vld [vmem:[#allocation2 + $0x1c4] ss:$16 sps:$4 sm:$0xff]   ;;  %v3096_v28 = vld [vmem:[#allocation2 + $0x1cc] ss:$16 sps:$4 sm:$0xff]  }
  0x2b   :  { %1927 = vmatpush1.bf16.msra.mxu0 %v3013_v41  ;;  %v3091_v29 = vld [vmem:[#allocation2 + $0x1c0] ss:$16 sps:$4 sm:$0xff]   ;;  %v3094_v30 = vld [vmem:[#allocation2 + $0x1c8] ss:$16 sps:$4 sm:$0xff]   ;;  %v3099_v31 = vld [vmem:[#allocation2 + $0x1e4] ss:$16 sps:$4 sm:$0xff]  }
  0x2c   :  { %1928 = vmatprep.subr.bf16.mxu0 %v3021_v42  ;;  %2091 = vmatpush1.bf16.msra.mxu1 %v3016_v43  ;;  %v3102_v32 = vld [vmem:[#allocation2 + $0x1ec] ss:$16 sps:$4 sm:$0xff]   ;;  %v3097_v33 = vld [vmem:[#allocation2 + $0x1e0] ss:$16 sps:$4 sm:$0xff]   ;;  %v3100_v34 = vld [vmem:[#allocation2 + $0x1e8] ss:$16 sps:$4 sm:$0xff]  }
  0x2d   :  { %2092 = vmatprep.subr.bf16.mxu1 %v3024_v44  ;;  %v3105_v35 = vld [vmem:[#allocation2 + $0x204] ss:$16 sps:$4 sm:$0xff]   ;;  %v3108_v36 = vld [vmem:[#allocation2 + $0x20c] ss:$16 sps:$4 sm:$0xff]   ;;  %v3556_v38 = vshrl.u32 %v57_v37, 7 }
  0x2e   :  { %v3562_v40 = vld [vmem:[%s3717_s2] sm:$0xff] }
  0x2f   :  { %1929 = vmatpush1.bf16.msra.mxu0 %v3019_v45  ;;  %v59_v39 = vsub.s32 0, %v3556_v38  ;;  %v63_v41 = vsub.s32 1, %v3556_v38  ;;  %v71_v42 = vsub.s32 3, %v3556_v38  ;;  %v3153_v37 = vld [vmem:[#allocation2 + $0x304] ss:$16 sps:$4 sm:$0xff]  }
  0x30   :  { %1930 = vmatprep.subr.bf16.mxu0 %v3027_v46  ;;  %2093 = vmatpush1.bf16.msra.mxu1 %v3022_v47 }
  0x31   :  { %2094 = vmatprep.subr.bf16.mxu1 %v3030_v48  ;;  %v60_v43 = vrot.slane %v3562_v40, %v59_v39  ;;  %v64_v44 = vrot.slane %v3562_v40, %v63_v41  ;;  %v72_v45 = vrot.slane %v3562_v40, %v71_v42 }
  0x33   :  { %1931 = vmatpush1.bf16.msra.mxu0 %v3025_v49 }
  0x34   :  { %1932 = vmatprep.subr.bf16.mxu0 %v3033_v50  ;;  %2095 = vmatpush1.bf16.msra.mxu1 %v3028_v51 }
  0x35   :  { %2096 = vmatprep.subr.bf16.mxu1 %v3036_v52 }
  0x37   :  { %1933 = vmatpush1.bf16.msra.mxu0 %v3031_v53 }
  0x38   :  { %1934 = vmatprep.subr.bf16.mxu0 %v3039_v54  ;;  %2097 = vmatpush1.bf16.msra.mxu1 %v3034_v55 }
  0x39   :  { %2098 = vmatprep.subr.bf16.mxu1 %v3042_v56 }
  0x3b   :  { %1935 = vmatpush1.bf16.msra.mxu0 %v3037_v57 }
  0x3c   :  { %1936 = vmatprep.subr.bf16.mxu0 %v3045_v58  ;;  %2099 = vmatpush1.bf16.msra.mxu1 %v3040_v59 }
  0x3d   :  { %2100 = vmatprep.subr.bf16.mxu1 %v3048_v60 }
  0x3f   :  { %1937 = vmatpush1.bf16.msra.mxu0 %v3043_v61  ;;  %v3103_v61 = vld [vmem:[#allocation2 + $0x200] ss:$16 sps:$4 sm:$0xff]  }
  0x40   :  { %1938 = vmatprep.subr.bf16.mxu0 %v3051_v63  ;;  %2101 = vmatpush1.bf16.msra.mxu1 %v3046_v62  ;;  %v3106_v62 = vld [vmem:[#allocation2 + $0x208] ss:$16 sps:$4 sm:$0xff]  }
  0x41   :  { %2102 = vmatprep.subr.bf16.mxu1 %v3054_v0  ;;  %v3111_v0 = vld [vmem:[#allocation2 + $0x224] ss:$16 sps:$4 sm:$0xff]  }
  0x43   :  { %1939 = vmatpush1.bf16.msra.mxu0 %v3049_v1  ;;  %v3114_v1 = vld [vmem:[#allocation2 + $0x22c] ss:$16 sps:$4 sm:$0xff]  }
  0x44   :  { %1940 = vmatprep.subr.bf16.mxu0 %v3057_v2  ;;  %2103 = vmatpush1.bf16.msra.mxu1 %v3052_v3 }
  0x45   :  { %2104 = vmatprep.subr.bf16.mxu1 %v3060_v4 }
  0x47   :  { %1941 = vmatpush1.bf16.msra.mxu0 %v3055_v5  ;;  %v3109_v5 = vld [vmem:[#allocation2 + $0x220] ss:$16 sps:$4 sm:$0xff]  }
  0x48   :  { %1942 = vmatprep.subr.bf16.mxu0 %v3063_v6  ;;  %2105 = vmatpush1.bf16.msra.mxu1 %v3058_v7  ;;  %v3112_v6 = vld [vmem:[#allocation2 + $0x228] ss:$16 sps:$4 sm:$0xff]  }
  0x49   :  { %2106 = vmatprep.subr.bf16.mxu1 %v3066_v8  ;;  %v3117_v8 = vld [vmem:[#allocation2 + $0x244] ss:$16 sps:$4 sm:$0xff]  }
  0x4b   :  { %1943 = vmatpush1.bf16.msra.mxu0 %v3061_v9  ;;  %v3120_v9 = vld [vmem:[#allocation2 + $0x24c] ss:$16 sps:$4 sm:$0xff]  }
  0x4c   :  { %1944 = vmatprep.subr.bf16.mxu0 %v3069_v10  ;;  %2107 = vmatpush1.bf16.msra.mxu1 %v3064_v11  ;;  %v3115_v11 = vld [vmem:[#allocation2 + $0x240] ss:$16 sps:$4 sm:$0xff]  }
  0x4d   :  { %2108 = vmatprep.subr.bf16.mxu1 %v3072_v12  ;;  %v3118_v12 = vld [vmem:[#allocation2 + $0x248] ss:$16 sps:$4 sm:$0xff]  }
  0x4f   :  { %1945 = vmatpush1.bf16.msra.mxu0 %v3067_v13  ;;  %v3123_v13 = vld [vmem:[#allocation2 + $0x264] ss:$16 sps:$4 sm:$0xff]  }
  0x50   :  { %1946 = vmatprep.subr.bf16.mxu0 %v3075_v14  ;;  %2109 = vmatpush1.bf16.msra.mxu1 %v3070_v15  ;;  %v3126_v14 = vld [vmem:[#allocation2 + $0x26c] ss:$16 sps:$4 sm:$0xff]   ;;  %v3121_v15 = vld [vmem:[#allocation2 + $0x260] ss:$16 sps:$4 sm:$0xff]  }
  0x51   :  { %2110 = vmatprep.subr.bf16.mxu1 %v3078_v16  ;;  %v3124_v16 = vld [vmem:[#allocation2 + $0x268] ss:$16 sps:$4 sm:$0xff]  }
  0x53   :  { %1947 = vmatpush1.bf16.msra.mxu0 %v3073_v17  ;;  %v3129_v17 = vld [vmem:[#allocation2 + $0x284] ss:$16 sps:$4 sm:$0xff]  }
  0x54   :  { %1948 = vmatprep.subr.bf16.mxu0 %v3081_v18  ;;  %2111 = vmatpush1.bf16.msra.mxu1 %v3076_v19  ;;  %v3132_v18 = vld [vmem:[#allocation2 + $0x28c] ss:$16 sps:$4 sm:$0xff]   ;;  %v3127_v19 = vld [vmem:[#allocation2 + $0x280] ss:$16 sps:$4 sm:$0xff]  }
  0x55   :  { %2112 = vmatprep.subr.bf16.mxu1 %v3084_v20  ;;  %v3130_v20 = vld [vmem:[#allocation2 + $0x288] ss:$16 sps:$4 sm:$0xff]  }
  0x57   :  { %1949 = vmatpush1.bf16.msra.mxu0 %v3079_v21  ;;  %v3135_v21 = vld [vmem:[#allocation2 + $0x2a4] ss:$16 sps:$4 sm:$0xff]  }
  0x58   :  { %1950 = vmatprep.subr.bf16.mxu0 %v3087_v22  ;;  %2113 = vmatpush1.bf16.msra.mxu1 %v3082_v23  ;;  %v3138_v22 = vld [vmem:[#allocation2 + $0x2ac] ss:$16 sps:$4 sm:$0xff]   ;;  %v3133_v23 = vld [vmem:[#allocation2 + $0x2a0] ss:$16 sps:$4 sm:$0xff]  }
  0x59   :  { %2114 = vmatprep.subr.bf16.mxu1 %v3090_v24  ;;  %v3136_v24 = vld [vmem:[#allocation2 + $0x2a8] ss:$16 sps:$4 sm:$0xff]  }
  0x5b   :  { %1951 = vmatpush1.bf16.msra.mxu0 %v3085_v25 }
  0x5c   :  { %2115 = vmatpush1.bf16.msra.mxu1 %v3088_v26  ;;  %1952 = vmatprep.subr.bf16.mxu0 %v3093_v27  ;;  %v3141_v26 = vld [vmem:[#allocation2 + $0x2c4] ss:$16 sps:$4 sm:$0xff]   ;;  %v3144_v27 = vld [vmem:[#allocation2 + $0x2cc] ss:$16 sps:$4 sm:$0xff]  }
  0x5d   :  { %2116 = vmatprep.subr.bf16.mxu1 %v3096_v28 }
  0x5f   :  { %1953 = vmatpush1.bf16.msra.mxu0 %v3091_v29 }
  0x60   :  { %2117 = vmatpush1.bf16.msra.mxu1 %v3094_v30  ;;  %1954 = vmatprep.subr.bf16.mxu0 %v3099_v31  ;;  %v3139_v31 = vld [vmem:[#allocation2 + $0x2c0] ss:$16 sps:$4 sm:$0xff]  }
  0x61   :  { %2118 = vmatprep.subr.bf16.mxu1 %v3102_v32  ;;  %v3142_v32 = vld [vmem:[#allocation2 + $0x2c8] ss:$16 sps:$4 sm:$0xff]  }
  0x63   :  { %1955 = vmatpush1.bf16.msra.mxu0 %v3097_v33  ;;  %v3147_v33 = vld [vmem:[#allocation2 + $0x2e4] ss:$16 sps:$4 sm:$0xff]  }
  0x64   :  { %2119 = vmatpush1.bf16.msra.mxu1 %v3100_v34  ;;  %1965 = vmatprep.subr.bf16.mxu0 %v3105_v35  ;;  %v3150_v34 = vld [vmem:[#allocation2 + $0x2ec] ss:$16 sps:$4 sm:$0xff]   ;;  %v3145_v35 = vld [vmem:[#allocation2 + $0x2e0] ss:$16 sps:$4 sm:$0xff]  }
  0x65   :  { %2129 = vmatprep.subr.bf16.mxu1 %v3108_v36  ;;  %v3148_v36 = vld [vmem:[#allocation2 + $0x2e8] ss:$16 sps:$4 sm:$0xff]  }
  0xf1   :  { %v220_v46 = vpop.f32.mrb[0].mxu0  ;;  %v3575_v49 = vpop.f32.mrb[0].mxu1 }
  0xf2   :  { %v221_v47 = vadd.f32 %v220_v46, %v60_v43  ;;  %v222_v48 = vpop.f32.mrb[1].mxu0  ;;  %v263_v52 = vpop.f32.mrb[1].mxu1  ;;  %v3156_v43 = vld [vmem:[#allocation2 + $0x30c] ss:$16 sps:$4 sm:$0xff]   ;;  %v3159_v46 = vld [vmem:[#allocation2 + $0x324] ss:$16 sps:$4 sm:$0xff]  }
  0xf3   :  { %v223_v50 = vadd.f32 %v222_v48, %v64_v44  ;;  %v224_v51 = vpop.f32.mrb[2].mxu0  ;;  %v264_v55 = vadd.f32 %v263_v52, %v72_v45  ;;  %v265_v56 = vpop.f32.mrb[2].mxu1  ;;  %v3151_v44 = vld [vmem:[#allocation2 + $0x300] ss:$16 sps:$4 sm:$0xff]   ;;  %v3154_v45 = vld [vmem:[#allocation2 + $0x308] ss:$16 sps:$4 sm:$0xff]  }
  0xf4   :  { %v350_v53 = vmax.f32 %v221_v47, 0.0  ;;  %v225_v54 = vpop.f32.mrb[3].mxu0  ;;  %v266_v58 = vpop.f32.mrb[3].mxu1  ;;  %v3162_v47 = vld [vmem:[#allocation2 + $0x32c] ss:$16 sps:$4 sm:$0xff]  }
  0xf5   :  { %v351_v57 = vmax.f32 %v223_v50, 0.0  ;;  %v353_v59 = vmax.f32 %v264_v55, 0.0  ;;  %v3157_v48 = vld [vmem:[#allocation2 + $0x320] ss:$16 sps:$4 sm:$0xff]   ;;  %v3160_v50 = vld [vmem:[#allocation2 + $0x328] ss:$16 sps:$4 sm:$0xff]  }
  0xf6   :  { %v358_v63 = vpack.c.bf16 %v350_v53, %v350_v53  ;;  %v3165_v51 = vld [vmem:[#allocation2 + $0x344] ss:$16 sps:$4 sm:$0xff]   ;;  %v3168_v52 = vld [vmem:[#allocation2 + $0x34c] ss:$16 sps:$4 sm:$0xff]   ;;  %v3163_v53 = vld [vmem:[#allocation2 + $0x340] ss:$16 sps:$4 sm:$0xff]  }
  0xf7   :  { %v359_v60 = vpack.c.bf16 %v351_v57, %v351_v57  ;;  %v361_v2 = vpack.c.bf16 %v353_v59, %v353_v59  ;;  %v3166_v54 = vld [vmem:[#allocation2 + $0x348] ss:$16 sps:$4 sm:$0xff]   ;;  %v3171_v55 = vld [vmem:[#allocation2 + $0x364] ss:$16 sps:$4 sm:$0xff]   ;;  %v3174_v56 = vld [vmem:[#allocation2 + $0x36c] ss:$16 sps:$4 sm:$0xff]  }
  0xf8   :  { %v3169_v57 = vld [vmem:[#allocation2 + $0x360] ss:$16 sps:$4 sm:$0xff]   ;;  %v3172_v58 = vld [vmem:[#allocation2 + $0x368] ss:$16 sps:$4 sm:$0xff]   ;;  %v3177_v59 = vld [vmem:[#allocation2 + $0x384] ss:$16 sps:$4 sm:$0xff]  }
  0xf9   :  { %1956 = vmatprep.mubr.bf16.mxu0 %v359_v60  ;;  %2120 = vmatprep.mubr.bf16.mxu1 %v359_v60  ;;  %v3577_v3 = vpop.f32.mrb[4].mxu0  ;;  %v3180_v60 = vld [vmem:[#allocation2 + $0x38c] ss:$16 sps:$4 sm:$0xff]  }
  0xfa   :  { %1957 = vmatmul.mubr.bf16.vlgmr.msra.gmra.mrb[8].mxu0 %v358_v63  ;;  %2121 = vmatmul.mubr.bf16.vlgmr.msra.gmra.mrb[8].mxu1 %v358_v63  ;;  %v3579_v4 = vpop.f32.mrb[5].mxu0  ;;  %v3581_v25 = vpop.f32.mrb[4].mxu1  ;;  %v3178_v63 = vld [vmem:[#allocation2 + $0x388] ss:$16 sps:$4 sm:$0xff]  }
  0xfb   :  { %1966 = vmatpush1.bf16.msra.mxu0 %v3103_v61  ;;  %2130 = vmatpush1.bf16.msra.mxu1 %v3106_v62  ;;  %v306_v7 = vpop.f32.mrb[6].mxu0  ;;  %v3583_v28 = vpop.f32.mrb[5].mxu1  ;;  %v67_v61 = vsub.s32 2, %v3556_v38  ;;  %v3175_v62 = vld [vmem:[#allocation2 + $0x380] ss:$16 sps:$4 sm:$0xff]  }
  0xfc   :  { %1967 = vmatprep.subr.bf16.mxu0 %v3111_v0  ;;  %2131 = vmatprep.subr.bf16.mxu1 %v3114_v1  ;;  %v307_v10 = vpop.f32.mrb[7].mxu0  ;;  %v347_v29 = vpop.f32.mrb[6].mxu1  ;;  %v3183_v0 = vld [vmem:[#allocation2 + $0x3a4] ss:$16 sps:$4 sm:$0xff]   ;;  %v3186_v1 = vld [vmem:[#allocation2 + $0x3ac] ss:$16 sps:$4 sm:$0xff]  }
  0xfd   :  { %1997 = vmatprep.mubr.bf16.mxu0 %v361_v2  ;;  %2161 = vmatprep.mubr.bf16.mxu1 %v361_v2  ;;  %v348_v30 = vpop.f32.mrb[7].mxu1  ;;  %v79_v2 = vsub.s32 5, %v3556_v38  ;;  %v3184_v7 = vld [vmem:[#allocation2 + $0x3a8] ss:$16 sps:$4 sm:$0xff]   ;;  %v3205_v29 = vld [vmem:[#allocation2 + $0x420] ss:$16 sps:$4 sm:$0xff]  }
  0xfe   :  { %v3208_v30 = vld [vmem:[#allocation2 + $0x428] ss:$16 sps:$4 sm:$0xff]  }
  0xff   :  { %1968 = vmatpush1.bf16.msra.mxu0 %v3109_v5  ;;  %2132 = vmatpush1.bf16.msra.mxu1 %v3112_v6  ;;  %v68_v5 = vrot.slane %v3562_v40, %v67_v61  ;;  %v3181_v6 = vld [vmem:[#allocation2 + $0x3a0] ss:$16 sps:$4 sm:$0xff]   ;;  %v80_v10 = vrot.slane %v3562_v40, %v79_v2  ;;  %v3255_v2 = vld [vmem:[#allocation2 + $0x524] ss:$16 sps:$4 sm:$0xff]  }
 0x100   :  { %1969 = vmatprep.subr.bf16.mxu0 %v3117_v8  ;;  %2133 = vmatprep.subr.bf16.mxu1 %v3120_v9  ;;  %v3189_v8 = vld [vmem:[#allocation2 + $0x3c4] ss:$16 sps:$4 sm:$0xff]   ;;  %v3192_v9 = vld [vmem:[#allocation2 + $0x3cc] ss:$16 sps:$4 sm:$0xff]  }
 0x103   :  { %1970 = vmatpush1.bf16.msra.mxu0 %v3115_v11  ;;  %2134 = vmatpush1.bf16.msra.mxu1 %v3118_v12  ;;  %v262_v11 = vadd.f32 %v3575_v49, %v68_v5  ;;  %v3187_v12 = vld [vmem:[#allocation2 + $0x3c0] ss:$16 sps:$4 sm:$0xff]   ;;  %v3258_v5 = vld [vmem:[#allocation2 + $0x52c] ss:$16 sps:$4 sm:$0xff]  }
 0x104   :  { %1971 = vmatprep.subr.bf16.mxu0 %v3123_v13  ;;  %2135 = vmatprep.subr.bf16.mxu1 %v3126_v14  ;;  %v3190_v13 = vld [vmem:[#allocation2 + $0x3c8] ss:$16 sps:$4 sm:$0xff]   ;;  %v3195_v14 = vld [vmem:[#allocation2 + $0x3e4] ss:$16 sps:$4 sm:$0xff]  }
 0x107   :  { %1972 = vmatpush1.bf16.msra.mxu0 %v3121_v15  ;;  %2136 = vmatpush1.bf16.msra.mxu1 %v3124_v16  ;;  %v3198_v15 = vld [vmem:[#allocation2 + $0x3ec] ss:$16 sps:$4 sm:$0xff]   ;;  %v305_v16 = vadd.f32 %v3579_v4, %v80_v10  ;;  %v3259_v10 = vld [vmem:[#allocation2 + $0x540] ss:$16 sps:$4 sm:$0xff]  }
 0x108   :  { %1973 = vmatprep.subr.bf16.mxu0 %v3129_v17  ;;  %2137 = vmatprep.subr.bf16.mxu1 %v3132_v18  ;;  %v352_v17 = vmax.f32 %v262_v11, 0.0  ;;  %v3193_v18 = vld [vmem:[#allocation2 + $0x3e0] ss:$16 sps:$4 sm:$0xff]   ;;  %v3262_v11 = vld [vmem:[#allocation2 + $0x548] ss:$16 sps:$4 sm:$0xff]  }
 0x109   :  { %v355_v49 = vmax.f32 %v305_v16, 0.0  ;;  %v3273_v16 = vld [vmem:[#allocation2 + $0x584] ss:$16 sps:$4 sm:$0xff]  }
 0x10b   :  { %1974 = vmatpush1.bf16.msra.mxu0 %v3127_v19  ;;  %2138 = vmatpush1.bf16.msra.mxu1 %v3130_v20  ;;  %v3196_v19 = vld [vmem:[#allocation2 + $0x3e8] ss:$16 sps:$4 sm:$0xff]   ;;  %v3201_v20 = vld [vmem:[#allocation2 + $0x404] ss:$16 sps:$4 sm:$0xff]   ;;  %v363_v4 = vpack.c.bf16 %v355_v49, %v355_v49  ;;  %v3282_v49 = vld [vmem:[#allocation2 + $0x5ac] ss:$16 sps:$4 sm:$0xff]  }
 0x10c   :  { %1975 = vmatprep.subr.bf16.mxu0 %v3135_v21  ;;  %2139 = vmatprep.subr.bf16.mxu1 %v3138_v22  ;;  %v3204_v21 = vld [vmem:[#allocation2 + $0x40c] ss:$16 sps:$4 sm:$0xff]   ;;  %v360_v22 = vpack.c.bf16 %v352_v17, %v352_v17 }
 0x10d   :  { %v3276_v17 = vld [vmem:[#allocation2 + $0x58c] ss:$16 sps:$4 sm:$0xff]  }
 0x10f   :  { %1976 = vmatpush1.bf16.msra.mxu0 %v3133_v23  ;;  %2140 = vmatpush1.bf16.msra.mxu1 %v3136_v24  ;;  %v3199_v23 = vld [vmem:[#allocation2 + $0x400] ss:$16 sps:$4 sm:$0xff]   ;;  %v3202_v24 = vld [vmem:[#allocation2 + $0x408] ss:$16 sps:$4 sm:$0xff]  }
 0x110   :  { %1977 = vmatprep.subr.bf16.mxu0 %v3141_v26  ;;  %2141 = vmatprep.subr.bf16.mxu1 %v3144_v27  ;;  %v3207_v26 = vld [vmem:[#allocation2 + $0x424] ss:$16 sps:$4 sm:$0xff]   ;;  %v3210_v27 = vld [vmem:[#allocation2 + $0x42c] ss:$16 sps:$4 sm:$0xff]  }
 0x113   :  { %1978 = vmatpush1.bf16.msra.mxu0 %v3139_v31  ;;  %2142 = vmatpush1.bf16.msra.mxu1 %v3142_v32  ;;  %v3213_v31 = vld [vmem:[#allocation2 + $0x444] ss:$16 sps:$4 sm:$0xff]   ;;  %v3216_v32 = vld [vmem:[#allocation2 + $0x44c] ss:$16 sps:$4 sm:$0xff]  }
 0x114   :  { %1979 = vmatprep.subr.bf16.mxu0 %v3147_v33  ;;  %2143 = vmatprep.subr.bf16.mxu1 %v3150_v34  ;;  %v3211_v33 = vld [vmem:[#allocation2 + $0x440] ss:$16 sps:$4 sm:$0xff]   ;;  %v3214_v34 = vld [vmem:[#allocation2 + $0x448] ss:$16 sps:$4 sm:$0xff]  }
 0x117   :  { %1980 = vmatpush1.bf16.msra.mxu0 %v3145_v35  ;;  %2144 = vmatpush1.bf16.msra.mxu1 %v3148_v36  ;;  %v3219_v35 = vld [vmem:[#allocation2 + $0x464] ss:$16 sps:$4 sm:$0xff]   ;;  %v3222_v36 = vld [vmem:[#allocation2 + $0x46c] ss:$16 sps:$4 sm:$0xff]  }
 0x118   :  { %1981 = vmatprep.subr.bf16.mxu0 %v3153_v37  ;;  %2145 = vmatprep.subr.bf16.mxu1 %v3156_v43  ;;  %v3217_v37 = vld [vmem:[#allocation2 + $0x460] ss:$16 sps:$4 sm:$0xff]   ;;  %v3220_v43 = vld [vmem:[#allocation2 + $0x468] ss:$16 sps:$4 sm:$0xff]  }
 0x11b   :  { %1982 = vmatpush1.bf16.msra.mxu0 %v3151_v44  ;;  %2146 = vmatpush1.bf16.msra.mxu1 %v3154_v45  ;;  %v3225_v44 = vld [vmem:[#allocation2 + $0x484] ss:$16 sps:$4 sm:$0xff]   ;;  %v3228_v45 = vld [vmem:[#allocation2 + $0x48c] ss:$16 sps:$4 sm:$0xff]  }
 0x11c   :  { %1983 = vmatprep.subr.bf16.mxu0 %v3159_v46  ;;  %2147 = vmatprep.subr.bf16.mxu1 %v3162_v47  ;;  %v3223_v46 = vld [vmem:[#allocation2 + $0x480] ss:$16 sps:$4 sm:$0xff]   ;;  %v3226_v47 = vld [vmem:[#allocation2 + $0x488] ss:$16 sps:$4 sm:$0xff]  }
 0x11f   :  { %1984 = vmatpush1.bf16.msra.mxu0 %v3157_v48  ;;  %2148 = vmatpush1.bf16.msra.mxu1 %v3160_v50  ;;  %v3231_v48 = vld [vmem:[#allocation2 + $0x4a4] ss:$16 sps:$4 sm:$0xff]   ;;  %v3234_v50 = vld [vmem:[#allocation2 + $0x4ac] ss:$16 sps:$4 sm:$0xff]  }
 0x120   :  { %1985 = vmatprep.subr.bf16.mxu0 %v3165_v51  ;;  %2149 = vmatprep.subr.bf16.mxu1 %v3168_v52  ;;  %v3229_v51 = vld [vmem:[#allocation2 + $0x4a0] ss:$16 sps:$4 sm:$0xff]   ;;  %v3232_v52 = vld [vmem:[#allocation2 + $0x4a8] ss:$16 sps:$4 sm:$0xff]  }
 0x123   :  { %1986 = vmatpush1.bf16.msra.mxu0 %v3163_v53  ;;  %2150 = vmatpush1.bf16.msra.mxu1 %v3166_v54  ;;  %v3237_v53 = vld [vmem:[#allocation2 + $0x4c4] ss:$16 sps:$4 sm:$0xff]   ;;  %v3240_v54 = vld [vmem:[#allocation2 + $0x4cc] ss:$16 sps:$4 sm:$0xff]  }
 0x124   :  { %1987 = vmatprep.subr.bf16.mxu0 %v3171_v55  ;;  %2151 = vmatprep.subr.bf16.mxu1 %v3174_v56  ;;  %v3235_v55 = vld [vmem:[#allocation2 + $0x4c0] ss:$16 sps:$4 sm:$0xff]   ;;  %v3238_v56 = vld [vmem:[#allocation2 + $0x4c8] ss:$16 sps:$4 sm:$0xff]  }
 0x127   :  { %1988 = vmatpush1.bf16.msra.mxu0 %v3169_v57  ;;  %2152 = vmatpush1.bf16.msra.mxu1 %v3172_v58  ;;  %v3243_v57 = vld [vmem:[#allocation2 + $0x4e4] ss:$16 sps:$4 sm:$0xff]   ;;  %v3246_v58 = vld [vmem:[#allocation2 + $0x4ec] ss:$16 sps:$4 sm:$0xff]  }
 0x128   :  { %1989 = vmatprep.subr.bf16.mxu0 %v3177_v59  ;;  %2153 = vmatprep.subr.bf16.mxu1 %v3180_v60  ;;  %v3241_v59 = vld [vmem:[#allocation2 + $0x4e0] ss:$16 sps:$4 sm:$0xff]   ;;  %v3244_v60 = vld [vmem:[#allocation2 + $0x4e8] ss:$16 sps:$4 sm:$0xff]  }
 0x12b   :  { %1990 = vmatpush1.bf16.msra.mxu0 %v3175_v62  ;;  %2154 = vmatpush1.bf16.msra.mxu1 %v3178_v63  ;;  %v3249_v62 = vld [vmem:[#allocation2 + $0x504] ss:$16 sps:$4 sm:$0xff]   ;;  %v3252_v63 = vld [vmem:[#allocation2 + $0x50c] ss:$16 sps:$4 sm:$0xff]  }
 0x12c   :  { %1991 = vmatprep.subr.bf16.mxu0 %v3183_v0  ;;  %2155 = vmatprep.subr.bf16.mxu1 %v3186_v1  ;;  %v3247_v0 = vld [vmem:[#allocation2 + $0x500] ss:$16 sps:$4 sm:$0xff]   ;;  %v3250_v1 = vld [vmem:[#allocation2 + $0x508] ss:$16 sps:$4 sm:$0xff]  }
 0x12f   :  { %1992 = vmatpush1.bf16.msra.mxu0 %v3181_v6  ;;  %2156 = vmatpush1.bf16.msra.mxu1 %v3184_v7  ;;  %v3253_v6 = vld [vmem:[#allocation2 + $0x520] ss:$16 sps:$4 sm:$0xff]   ;;  %v3256_v7 = vld [vmem:[#allocation2 + $0x528] ss:$16 sps:$4 sm:$0xff]  }
 0x130   :  { %1993 = vmatprep.subr.bf16.mxu0 %v3189_v8  ;;  %2157 = vmatprep.subr.bf16.mxu1 %v3192_v9  ;;  %v3261_v8 = vld [vmem:[#allocation2 + $0x544] ss:$16 sps:$4 sm:$0xff]   ;;  %v3264_v9 = vld [vmem:[#allocation2 + $0x54c] ss:$16 sps:$4 sm:$0xff]  }
 0x133   :  { %1994 = vmatpush1.bf16.msra.mxu0 %v3187_v12  ;;  %2158 = vmatpush1.bf16.msra.mxu1 %v3190_v13  ;;  %v3267_v12 = vld [vmem:[#allocation2 + $0x564] ss:$16 sps:$4 sm:$0xff]   ;;  %v3270_v13 = vld [vmem:[#allocation2 + $0x56c] ss:$16 sps:$4 sm:$0xff]  }
 0x134   :  { %1995 = vmatprep.subr.bf16.mxu0 %v3195_v14  ;;  %2159 = vmatprep.subr.bf16.mxu1 %v3198_v15  ;;  %v3265_v14 = vld [vmem:[#allocation2 + $0x560] ss:$16 sps:$4 sm:$0xff]   ;;  %v3268_v15 = vld [vmem:[#allocation2 + $0x568] ss:$16 sps:$4 sm:$0xff]  }
 0x137   :  { %1996 = vmatpush1.bf16.msra.mxu0 %v3193_v18  ;;  %2160 = vmatpush1.bf16.msra.mxu1 %v3196_v19  ;;  %v75_v18 = vsub.s32 4, %v3556_v38  ;;  %v3271_v19 = vld [vmem:[#allocation2 + $0x580] ss:$16 sps:$4 sm:$0xff]  }
 0x138   :  { %2006 = vmatprep.subr.bf16.mxu0 %v3201_v20  ;;  %2170 = vmatprep.subr.bf16.mxu1 %v3204_v21  ;;  %v3274_v20 = vld [vmem:[#allocation2 + $0x588] ss:$16 sps:$4 sm:$0xff]   ;;  %v3279_v21 = vld [vmem:[#allocation2 + $0x5a4] ss:$16 sps:$4 sm:$0xff]  }
 0x13a   :  { %1998 = vmatmul.mubr.bf16.vlgmr.msra.gmra.mrb[8].mxu0 %v360_v22  ;;  %2162 = vmatmul.mubr.bf16.vlgmr.msra.gmra.mrb[8].mxu1 %v360_v22  ;;  %v87_v22 = vsub.s32 7, %v3556_v38 }
 0x13b   :  { %2007 = vmatpush1.bf16.msra.mxu0 %v3199_v23  ;;  %2171 = vmatpush1.bf16.msra.mxu1 %v3202_v24  ;;  %v76_v23 = vrot.slane %v3562_v40, %v75_v18  ;;  %v3277_v24 = vld [vmem:[#allocation2 + $0x5a0] ss:$16 sps:$4 sm:$0xff]   ;;  %v3348_v18 = vld [vmem:[#allocation2 + $0x70c] ss:$16 sps:$4 sm:$0xff]  }
 0x13c   :  { %2008 = vmatprep.subr.bf16.mxu0 %v3207_v26  ;;  %2172 = vmatprep.subr.bf16.mxu1 %v3210_v27  ;;  %v3280_v26 = vld [vmem:[#allocation2 + $0x5a8] ss:$16 sps:$4 sm:$0xff]   ;;  %v3285_v27 = vld [vmem:[#allocation2 + $0x5c4] ss:$16 sps:$4 sm:$0xff]  }
 0x13d   :  { %2038 = vmatprep.mubr.bf16.mxu0 %v363_v4  ;;  %2202 = vmatprep.mubr.bf16.mxu1 %v363_v4  ;;  %v3288_v4 = vld [vmem:[#allocation2 + $0x5cc] ss:$16 sps:$4 sm:$0xff]  }
 0x13f   :  { %2009 = vmatpush1.bf16.msra.mxu0 %v3205_v29  ;;  %2173 = vmatpush1.bf16.msra.mxu1 %v3208_v30  ;;  %v88_v29 = vrot.slane %v3562_v40, %v87_v22  ;;  %v303_v30 = vadd.f32 %v3577_v3, %v76_v23  ;;  %v3349_v22 = vld [vmem:[#allocation2 + $0x720] ss:$16 sps:$4 sm:$0xff]   ;;  %v3352_v23 = vld [vmem:[#allocation2 + $0x728] ss:$16 sps:$4 sm:$0xff]  }
 0x140   :  { %2010 = vmatprep.subr.bf16.mxu0 %v3213_v31  ;;  %2174 = vmatprep.subr.bf16.mxu1 %v3216_v32  ;;  %v3283_v31 = vld [vmem:[#allocation2 + $0x5c0] ss:$16 sps:$4 sm:$0xff]   ;;  %v3286_v32 = vld [vmem:[#allocation2 + $0x5c8] ss:$16 sps:$4 sm:$0xff]  }
 0x143   :  { %2011 = vmatpush1.bf16.msra.mxu0 %v3211_v33  ;;  %2175 = vmatpush1.bf16.msra.mxu1 %v3214_v34  ;;  %v3291_v33 = vld [vmem:[#allocation2 + $0x5e4] ss:$16 sps:$4 sm:$0xff]   ;;  %v3294_v34 = vld [vmem:[#allocation2 + $0x5ec] ss:$16 sps:$4 sm:$0xff]  }
 0x144   :  { %2012 = vmatprep.subr.bf16.mxu0 %v3219_v35  ;;  %2176 = vmatprep.subr.bf16.mxu1 %v3222_v36  ;;  %v346_v35 = vadd.f32 %v3583_v28, %v88_v29  ;;  %v354_v36 = vmax.f32 %v303_v30, 0.0  ;;  %v3363_v29 = vld [vmem:[#allocation2 + $0x764] ss:$16 sps:$4 sm:$0xff]   ;;  %v3366_v30 = vld [vmem:[#allocation2 + $0x76c] ss:$16 sps:$4 sm:$0xff]  }
 0x146   :  { %v357_v3 = vmax.f32 %v346_v35, 0.0  ;;  %v3367_v35 = vld [vmem:[#allocation2 + $0x780] ss:$16 sps:$4 sm:$0xff]  }
 0x147   :  { %2013 = vmatpush1.bf16.msra.mxu0 %v3217_v37  ;;  %2177 = vmatpush1.bf16.msra.mxu1 %v3220_v43  ;;  %v3289_v37 = vld [vmem:[#allocation2 + $0x5e0] ss:$16 sps:$4 sm:$0xff]   ;;  %v3292_v43 = vld [vmem:[#allocation2 + $0x5e8] ss:$16 sps:$4 sm:$0xff]  }
 0x148   :  { %2014 = vmatprep.subr.bf16.mxu0 %v3225_v44  ;;  %2178 = vmatprep.subr.bf16.mxu1 %v3228_v45  ;;  %v3297_v44 = vld [vmem:[#allocation2 + $0x604] ss:$16 sps:$4 sm:$0xff]   ;;  %v3300_v45 = vld [vmem:[#allocation2 + $0x60c] ss:$16 sps:$4 sm:$0xff]   ;;  %v365_v28 = vpack.c.bf16 %v357_v3, %v357_v3  ;;  %v3376_v3 = vld [vmem:[#allocation2 + $0x7a8] ss:$16 sps:$4 sm:$0xff]  }
 0x14b   :  { %2015 = vmatpush1.bf16.msra.mxu0 %v3223_v46  ;;  %2179 = vmatpush1.bf16.msra.mxu1 %v3226_v47  ;;  %v362_v46 = vpack.c.bf16 %v354_v36, %v354_v36  ;;  %v3295_v47 = vld [vmem:[#allocation2 + $0x600] ss:$16 sps:$4 sm:$0xff]   ;;  %v3370_v36 = vld [vmem:[#allocation2 + $0x788] ss:$16 sps:$4 sm:$0xff]  }
 0x14c   :  { %2016 = vmatprep.subr.bf16.mxu0 %v3231_v48  ;;  %2180 = vmatprep.subr.bf16.mxu1 %v3234_v50  ;;  %v3298_v48 = vld [vmem:[#allocation2 + $0x608] ss:$16 sps:$4 sm:$0xff]   ;;  %v3303_v50 = vld [vmem:[#allocation2 + $0x624] ss:$16 sps:$4 sm:$0xff]  }
 0x14f   :  { %2017 = vmatpush1.bf16.msra.mxu0 %v3229_v51  ;;  %2181 = vmatpush1.bf16.msra.mxu1 %v3232_v52  ;;  %v3306_v51 = vld [vmem:[#allocation2 + $0x62c] ss:$16 sps:$4 sm:$0xff]   ;;  %v3301_v52 = vld [vmem:[#allocation2 + $0x620] ss:$16 sps:$4 sm:$0xff]  }
 0x150   :  { %2018 = vmatprep.subr.bf16.mxu0 %v3237_v53  ;;  %2182 = vmatprep.subr.bf16.mxu1 %v3240_v54  ;;  %v3304_v53 = vld [vmem:[#allocation2 + $0x628] ss:$16 sps:$4 sm:$0xff]   ;;  %v3309_v54 = vld [vmem:[#allocation2 + $0x644] ss:$16 sps:$4 sm:$0xff]  }
 0x153   :  { %2019 = vmatpush1.bf16.msra.mxu0 %v3235_v55  ;;  %2183 = vmatpush1.bf16.msra.mxu1 %v3238_v56  ;;  %v3312_v55 = vld [vmem:[#allocation2 + $0x64c] ss:$16 sps:$4 sm:$0xff]   ;;  %v3307_v56 = vld [vmem:[#allocation2 + $0x640] ss:$16 sps:$4 sm:$0xff]  }
 0x154   :  { %2020 = vmatprep.subr.bf16.mxu0 %v3243_v57  ;;  %2184 = vmatprep.subr.bf16.mxu1 %v3246_v58  ;;  %v3310_v57 = vld [vmem:[#allocation2 + $0x648] ss:$16 sps:$4 sm:$0xff]   ;;  %v3315_v58 = vld [vmem:[#allocation2 + $0x664] ss:$16 sps:$4 sm:$0xff]  }
 0x157   :  { %2021 = vmatpush1.bf16.msra.mxu0 %v3241_v59  ;;  %2185 = vmatpush1.bf16.msra.mxu1 %v3244_v60  ;;  %v3318_v59 = vld [vmem:[#allocation2 + $0x66c] ss:$16 sps:$4 sm:$0xff]   ;;  %v3313_v60 = vld [vmem:[#allocation2 + $0x660] ss:$16 sps:$4 sm:$0xff]  }
 0x158   :  { %2022 = vmatprep.subr.bf16.mxu0 %v3249_v62  ;;  %2186 = vmatprep.subr.bf16.mxu1 %v3252_v63  ;;  %v3316_v62 = vld [vmem:[#allocation2 + $0x668] ss:$16 sps:$4 sm:$0xff]   ;;  %v3321_v63 = vld [vmem:[#allocation2 + $0x684] ss:$16 sps:$4 sm:$0xff]  }
 0x15b   :  { %2023 = vmatpush1.bf16.msra.mxu0 %v3247_v0  ;;  %2187 = vmatpush1.bf16.msra.mxu1 %v3250_v1  ;;  %v3324_v0 = vld [vmem:[#allocation2 + $0x68c] ss:$16 sps:$4 sm:$0xff]   ;;  %v3319_v1 = vld [vmem:[#allocation2 + $0x680] ss:$16 sps:$4 sm:$0xff]  }
 0x15c   :  { %2024 = vmatprep.subr.bf16.mxu0 %v3255_v2  ;;  %2188 = vmatprep.subr.bf16.mxu1 %v3258_v5  ;;  %v3322_v2 = vld [vmem:[#allocation2 + $0x688] ss:$16 sps:$4 sm:$0xff]   ;;  %v3327_v5 = vld [vmem:[#allocation2 + $0x6a4] ss:$16 sps:$4 sm:$0xff]  }
 0x15f   :  { %2025 = vmatpush1.bf16.msra.mxu0 %v3253_v6  ;;  %2189 = vmatpush1.bf16.msra.mxu1 %v3256_v7  ;;  %v3330_v6 = vld [vmem:[#allocation2 + $0x6ac] ss:$16 sps:$4 sm:$0xff]   ;;  %v3325_v7 = vld [vmem:[#allocation2 + $0x6a0] ss:$16 sps:$4 sm:$0xff]  }
 0x160   :  { %2026 = vmatprep.subr.bf16.mxu0 %v3261_v8  ;;  %2190 = vmatprep.subr.bf16.mxu1 %v3264_v9  ;;  %v3328_v8 = vld [vmem:[#allocation2 + $0x6a8] ss:$16 sps:$4 sm:$0xff]   ;;  %v3333_v9 = vld [vmem:[#allocation2 + $0x6c4] ss:$16 sps:$4 sm:$0xff]  }
 0x163   :  { %2027 = vmatpush1.bf16.msra.mxu0 %v3259_v10  ;;  %2191 = vmatpush1.bf16.msra.mxu1 %v3262_v11  ;;  %v3336_v10 = vld [vmem:[#allocation2 + $0x6cc] ss:$16 sps:$4 sm:$0xff]   ;;  %v3331_v11 = vld [vmem:[#allocation2 + $0x6c0] ss:$16 sps:$4 sm:$0xff]  }
 0x164   :  { %2028 = vmatprep.subr.bf16.mxu0 %v3267_v12  ;;  %2192 = vmatprep.subr.bf16.mxu1 %v3270_v13  ;;  %v3334_v12 = vld [vmem:[#allocation2 + $0x6c8] ss:$16 sps:$4 sm:$0xff]   ;;  %v3339_v13 = vld [vmem:[#allocation2 + $0x6e4] ss:$16 sps:$4 sm:$0xff]  }
 0x167   :  { %2029 = vmatpush1.bf16.msra.mxu0 %v3265_v14  ;;  %2193 = vmatpush1.bf16.msra.mxu1 %v3268_v15  ;;  %v3342_v14 = vld [vmem:[#allocation2 + $0x6ec] ss:$16 sps:$4 sm:$0xff]   ;;  %v3337_v15 = vld [vmem:[#allocation2 + $0x6e0] ss:$16 sps:$4 sm:$0xff]  }
 0x168   :  { %2030 = vmatprep.subr.bf16.mxu0 %v3273_v16  ;;  %2194 = vmatprep.subr.bf16.mxu1 %v3276_v17  ;;  %v3340_v16 = vld [vmem:[#allocation2 + $0x6e8] ss:$16 sps:$4 sm:$0xff]   ;;  %v3345_v17 = vld [vmem:[#allocation2 + $0x704] ss:$16 sps:$4 sm:$0xff]  }
 0x16b   :  { %2031 = vmatpush1.bf16.msra.mxu0 %v3271_v19  ;;  %2195 = vmatpush1.bf16.msra.mxu1 %v3274_v20  ;;  %v3343_v19 = vld [vmem:[#allocation2 + $0x700] ss:$16 sps:$4 sm:$0xff]   ;;  %v3346_v20 = vld [vmem:[#allocation2 + $0x708] ss:$16 sps:$4 sm:$0xff]  }
 0x16c   :  { %2032 = vmatprep.subr.bf16.mxu0 %v3279_v21  ;;  %2196 = vmatprep.subr.bf16.mxu1 %v3282_v49  ;;  %v3351_v21 = vld [vmem:[#allocation2 + $0x724] ss:$16 sps:$4 sm:$0xff]   ;;  %v3354_v49 = vld [vmem:[#allocation2 + $0x72c] ss:$16 sps:$4 sm:$0xff]  }
 0x16f   :  { %2033 = vmatpush1.bf16.msra.mxu0 %v3277_v24  ;;  %2197 = vmatpush1.bf16.msra.mxu1 %v3280_v26  ;;  %v3357_v24 = vld [vmem:[#allocation2 + $0x744] ss:$16 sps:$4 sm:$0xff]   ;;  %v3360_v26 = vld [vmem:[#allocation2 + $0x74c] ss:$16 sps:$4 sm:$0xff]  }
 0x170   :  { %2034 = vmatprep.subr.bf16.mxu0 %v3285_v27  ;;  %2198 = vmatprep.subr.bf16.mxu1 %v3288_v4  ;;  %v3355_v27 = vld [vmem:[#allocation2 + $0x740] ss:$16 sps:$4 sm:$0xff]   ;;  %v3358_v4 = vld [vmem:[#allocation2 + $0x748] ss:$16 sps:$4 sm:$0xff]  }
 0x173   :  { %2035 = vmatpush1.bf16.msra.mxu0 %v3283_v31  ;;  %2199 = vmatpush1.bf16.msra.mxu1 %v3286_v32  ;;  %v3361_v31 = vld [vmem:[#allocation2 + $0x760] ss:$16 sps:$4 sm:$0xff]   ;;  %v3364_v32 = vld [vmem:[#allocation2 + $0x768] ss:$16 sps:$4 sm:$0xff]  }
 0x174   :  { %2036 = vmatprep.subr.bf16.mxu0 %v3291_v33  ;;  %2200 = vmatprep.subr.bf16.mxu1 %v3294_v34  ;;  %v3369_v33 = vld [vmem:[#allocation2 + $0x784] ss:$16 sps:$4 sm:$0xff]   ;;  %v3372_v34 = vld [vmem:[#allocation2 + $0x78c] ss:$16 sps:$4 sm:$0xff]  }
 0x177   :  { %2037 = vmatpush1.bf16.msra.mxu0 %v3289_v37  ;;  %2201 = vmatpush1.bf16.msra.mxu1 %v3292_v43  ;;  %v83_v37 = vsub.s32 6, %v3556_v38  ;;  %v3375_v43 = vld [vmem:[#allocation2 + $0x7a4] ss:$16 sps:$4 sm:$0xff]  }
 0x178   :  { %2047 = vmatprep.subr.bf16.mxu0 %v3297_v44  ;;  %2211 = vmatprep.subr.bf16.mxu1 %v3300_v45  ;;  %v3378_v44 = vld [vmem:[#allocation2 + $0x7ac] ss:$16 sps:$4 sm:$0xff]   ;;  %v3373_v45 = vld [vmem:[#allocation2 + $0x7a0] ss:$16 sps:$4 sm:$0xff]  }
 0x17a   :  { %2039 = vmatmul.mubr.bf16.vlgmr.msra.gmra.mrb[8].mxu0 %v362_v46  ;;  %2203 = vmatmul.mubr.bf16.vlgmr.msra.gmra.mrb[8].mxu1 %v362_v46  ;;  %v84_v46 = vrot.slane %v3562_v40, %v83_v37  ;;  %v3391_v40 = vld [vmem:[%s3720_s5 + $0x40] sm:$0xff]  }
 0x17b   :  { %2048 = vmatpush1.bf16.msra.mxu0 %v3295_v47  ;;  %2212 = vmatpush1.bf16.msra.mxu1 %v3298_v48  ;;  %v3381_v47 = vld [vmem:[#allocation2 + $0x7c4] ss:$16 sps:$4 sm:$0xff]   ;;  %v3384_v48 = vld [vmem:[#allocation2 + $0x7cc] ss:$16 sps:$4 sm:$0xff]  }
 0x17c   :  { %2049 = vmatprep.subr.bf16.mxu0 %v3303_v50  ;;  %2213 = vmatprep.subr.bf16.mxu1 %v3306_v51  ;;  %v3379_v50 = vld [vmem:[#allocation2 + $0x7c0] ss:$16 sps:$4 sm:$0xff]   ;;  %v3382_v51 = vld [vmem:[#allocation2 + $0x7c8] ss:$16 sps:$4 sm:$0xff]  }
 0x17d   :  { %2079 = vmatprep.mubr.bf16.mxu0 %v365_v28  ;;  %2243 = vmatprep.mubr.bf16.mxu1 %v365_v28  ;;  %v344_v28 = vadd.f32 %v3581_v25, %v84_v46  ;;  %v3393_v25 = vld [vmem:[%s3720_s5] sm:$0xff]  }
 0x17f   :  { %2050 = vmatpush1.bf16.msra.mxu0 %v3301_v52  ;;  %2214 = vmatpush1.bf16.msra.mxu1 %v3304_v53  ;;  %v3387_v52 = vld [vmem:[#allocation2 + $0x7e4] ss:$16 sps:$4 sm:$0xff]   ;;  %v3390_v53 = vld [vmem:[#allocation2 + $0x7ec] ss:$16 sps:$4 sm:$0xff]  }
 0x180   :  { %2051 = vmatprep.subr.bf16.mxu0 %v3309_v54  ;;  %2215 = vmatprep.subr.bf16.mxu1 %v3312_v55  ;;  %v3385_v54 = vld [vmem:[#allocation2 + $0x7e0] ss:$16 sps:$4 sm:$0xff]   ;;  %v3388_v55 = vld [vmem:[#allocation2 + $0x7e8] ss:$16 sps:$4 sm:$0xff]  }
 0x183   :  { %2052 = vmatpush1.bf16.msra.mxu0 %v3307_v56  ;;  %2216 = vmatpush1.bf16.msra.mxu1 %v3310_v57  ;;  %v356_v56 = vmax.f32 %v344_v28, 0.0  ;;  %v3392_v57 = vld [vmem:[%s3720_s5 + $0xc0] sm:$0xff]  }
 0x184   :  { %2053 = vmatprep.subr.bf16.mxu0 %v3315_v58  ;;  %2217 = vmatprep.subr.bf16.mxu1 %v3318_v59  ;;  %v3394_v58 = vld [vmem:[%s3720_s5 + $0x80] sm:$0xff]  }
 0x185   :  { %v364_v59 = vpack.c.bf16 %v356_v56, %v356_v56 }
 0x187   :  { %2054 = vmatpush1.bf16.msra.mxu0 %v3313_v60  ;;  %2218 = vmatpush1.bf16.msra.mxu1 %v3316_v62  ;;  %v3395_v60 = vld [vmem:[%s3720_s5 + $0x48] sm:$0xff]  }
 0x188   :  { %2055 = vmatprep.subr.bf16.mxu0 %v3321_v63  ;;  %2219 = vmatprep.subr.bf16.mxu1 %v3324_v0  ;;  %v3396_v62 = vld [vmem:[%s3720_s5 + $0xc8] sm:$0xff]  }
 0x189   :  { %v3397_v63 = vld [vmem:[%s3720_s5 + $0x8] sm:$0xff]  }
 0x18a   :  { %v3398_v0 = vld [vmem:[%s3720_s5 + $0x88] sm:$0xff]  }
 0x18b   :  { %2056 = vmatpush1.bf16.msra.mxu0 %v3319_v1  ;;  %2220 = vmatpush1.bf16.msra.mxu1 %v3322_v2  ;;  %v3399_v1 = vld [vmem:[%s3720_s5 + $0x50] sm:$0xff]  }
 0x18c   :  { %2057 = vmatprep.subr.bf16.mxu0 %v3327_v5  ;;  %2221 = vmatprep.subr.bf16.mxu1 %v3330_v6  ;;  %v3400_v2 = vld [vmem:[%s3720_s5 + $0xd0] sm:$0xff]  }
 0x18d   :  { %v3401_v5 = vld [vmem:[%s3720_s5 + $0x10] sm:$0xff]  }
 0x18e   :  { %v3402_v6 = vld [vmem:[%s3720_s5 + $0x90] sm:$0xff]  }
 0x18f   :  { %2058 = vmatpush1.bf16.msra.mxu0 %v3325_v7  ;;  %2222 = vmatpush1.bf16.msra.mxu1 %v3328_v8  ;;  %v3403_v7 = vld [vmem:[%s3720_s5 + $0x58] sm:$0xff]  }
 0x190   :  { %2059 = vmatprep.subr.bf16.mxu0 %v3333_v9  ;;  %2223 = vmatprep.subr.bf16.mxu1 %v3336_v10  ;;  %v3404_v8 = vld [vmem:[%s3720_s5 + $0xd8] sm:$0xff]  }
 0x191   :  { %v3405_v9 = vld [vmem:[%s3720_s5 + $0x18] sm:$0xff]  }
 0x192   :  { %v3406_v10 = vld [vmem:[%s3720_s5 + $0x98] sm:$0xff]  }
 0x193   :  { %2060 = vmatpush1.bf16.msra.mxu0 %v3331_v11  ;;  %2224 = vmatpush1.bf16.msra.mxu1 %v3334_v12  ;;  %v3407_v11 = vld [vmem:[%s3720_s5 + $0x60] sm:$0xff]  }
 0x194   :  { %2061 = vmatprep.subr.bf16.mxu0 %v3339_v13  ;;  %2225 = vmatprep.subr.bf16.mxu1 %v3342_v14  ;;  %v3408_v12 = vld [vmem:[%s3720_s5 + $0xe0] sm:$0xff]  }
 0x195   :  { %v3409_v13 = vld [vmem:[%s3720_s5 + $0x20] sm:$0xff]  }
 0x196   :  { %v3410_v14 = vld [vmem:[%s3720_s5 + $0xa0] sm:$0xff]  }
 0x197   :  { %2062 = vmatpush1.bf16.msra.mxu0 %v3337_v15  ;;  %2226 = vmatpush1.bf16.msra.mxu1 %v3340_v16  ;;  %v3411_v15 = vld [vmem:[%s3720_s5 + $0x68] sm:$0xff]  }
 0x198   :  { %2063 = vmatprep.subr.bf16.mxu0 %v3345_v17  ;;  %2227 = vmatprep.subr.bf16.mxu1 %v3348_v18  ;;  %v3412_v16 = vld [vmem:[%s3720_s5 + $0xe8] sm:$0xff]  }
 0x199   :  { %v3413_v17 = vld [vmem:[%s3720_s5 + $0x28] sm:$0xff]  }
 0x19a   :  { %v3414_v18 = vld [vmem:[%s3720_s5 + $0xa8] sm:$0xff]  }
 0x19b   :  { %2064 = vmatpush1.bf16.msra.mxu0 %v3343_v19  ;;  %2228 = vmatpush1.bf16.msra.mxu1 %v3346_v20  ;;  %v3415_v19 = vld [vmem:[%s3720_s5 + $0x70] sm:$0xff]  }
 0x19c   :  { %2065 = vmatprep.subr.bf16.mxu0 %v3351_v21  ;;  %2229 = vmatprep.subr.bf16.mxu1 %v3354_v49  ;;  %v3416_v20 = vld [vmem:[%s3720_s5 + $0xf0] sm:$0xff]  }
 0x19d   :  { %v3417_v21 = vld [vmem:[%s3720_s5 + $0x30] sm:$0xff]  }
 0x19e   :  { %v3418_v49 = vld [vmem:[%s3720_s5 + $0xb0] sm:$0xff]  }
 0x19f   :  { %2066 = vmatpush1.bf16.msra.mxu0 %v3349_v22  ;;  %2230 = vmatpush1.bf16.msra.mxu1 %v3352_v23  ;;  %v3419_v22 = vld [vmem:[%s3720_s5 + $0x78] sm:$0xff]  }
 0x1a0   :  { %2067 = vmatprep.subr.bf16.mxu0 %v3357_v24  ;;  %2231 = vmatprep.subr.bf16.mxu1 %v3360_v26  ;;  %v3420_v23 = vld [vmem:[%s3720_s5 + $0xf8] sm:$0xff]  }
 0x1a1   :  { %v3421_v24 = vld [vmem:[%s3720_s5 + $0x38] sm:$0xff]  }
 0x1a2   :  { %v3422_v26 = vld [vmem:[%s3720_s5 + $0xb8] sm:$0xff]  }
 0x1a3   :  { %2068 = vmatpush1.bf16.msra.mxu0 %v3355_v27  ;;  %2232 = vmatpush1.bf16.msra.mxu1 %v3358_v4  ;;  %v622_v27 = vld [vmem:[%s3719_s4] sm:$0xf] }
 0x1a4   :  { %2069 = vmatprep.subr.bf16.mxu0 %v3363_v29  ;;  %2233 = vmatprep.subr.bf16.mxu1 %v3366_v30  ;;  %v627_v4 = vrot.slane %v622_v27, %v59_v39  ;;  %v635_v29 = vrot.slane %v622_v27, %v67_v61  ;;  %v631_v30 = vrot.slane %v622_v27, %v63_v41 }
 0x1a7   :  { %2070 = vmatpush1.bf16.msra.mxu0 %v3361_v31  ;;  %2234 = vmatpush1.bf16.msra.mxu1 %v3364_v32  ;;  %v639_v31 = vrot.slane %v622_v27, %v71_v42 }
 0x1a8   :  { %2071 = vmatprep.subr.bf16.mxu0 %v3369_v33  ;;  %2235 = vmatprep.subr.bf16.mxu1 %v3372_v34 }
 0x1ab   :  { %2072 = vmatpush1.bf16.msra.mxu0 %v3367_v35  ;;  %2236 = vmatpush1.bf16.msra.mxu1 %v3370_v36 }
 0x1ac   :  { %2073 = vmatprep.subr.bf16.mxu0 %v3375_v43  ;;  %2237 = vmatprep.subr.bf16.mxu1 %v3378_v44 }
 0x1af   :  { %2074 = vmatpush1.bf16.msra.mxu0 %v3373_v45  ;;  %2238 = vmatpush1.bf16.msra.mxu1 %v3376_v3 }
 0x1b0   :  { %2075 = vmatprep.subr.bf16.mxu0 %v3381_v47  ;;  %2239 = vmatprep.subr.bf16.mxu1 %v3384_v48 }
 0x1b3   :  { %2076 = vmatpush1.bf16.msra.mxu0 %v3379_v50  ;;  %2240 = vmatpush1.bf16.msra.mxu1 %v3382_v51 }
 0x1b4   :  { %2077 = vmatprep.subr.bf16.mxu0 %v3387_v52  ;;  %2241 = vmatprep.subr.bf16.mxu1 %v3390_v53  ;;  %v2890_v53 = vld [vmem:[%s3721_s6] ss:$0 sm:$0xff] }
 0x1b7   :  { %2078 = vmatpush1.bf16.msra.mxu0 %v3385_v54  ;;  %2242 = vmatpush1.bf16.msra.mxu1 %v3388_v55 }
 0x1b8   :  { %2923 = vmatprep.subr.bf16.mxu0 %v3391_v40  ;;  %2945 = vmatprep.subr.bf16.mxu1 %v3392_v57 }
 0x1ba   :  { %2080 = vmatmul.mubr.bf16.vlgmr.msra.gmra.mrb[8].mxu0 %v364_v59  ;;  %2244 = vmatmul.mubr.bf16.vlgmr.msra.gmra.mrb[8].mxu1 %v364_v59 }
 0x1bb   :  { %2924 = vmatpush3.bf16.msra.mxu0 %v3393_v25  ;;  %2946 = vmatpush3.bf16.msra.mxu1 %v3394_v58 }
 0x1bc   :  { %2925 = vmatprep.subr.bf16.mxu0 %v3395_v60  ;;  %2947 = vmatprep.subr.bf16.mxu1 %v3396_v62 }
 0x1bf   :  { %2926 = vmatpush3.bf16.msra.mxu0 %v3397_v63  ;;  %2948 = vmatpush3.bf16.msra.mxu1 %v3398_v0 }
 0x1c0   :  { %2927 = vmatprep.subr.bf16.mxu0 %v3399_v1  ;;  %2949 = vmatprep.subr.bf16.mxu1 %v3400_v2 }
 0x1c3   :  { %2928 = vmatpush3.bf16.msra.mxu0 %v3401_v5  ;;  %2950 = vmatpush3.bf16.msra.mxu1 %v3402_v6 }
 0x1c4   :  { %2929 = vmatprep.subr.bf16.mxu0 %v3403_v7  ;;  %2951 = vmatprep.subr.bf16.mxu1 %v3404_v8 }
 0x1c7   :  { %2930 = vmatpush3.bf16.msra.mxu0 %v3405_v9  ;;  %2952 = vmatpush3.bf16.msra.mxu1 %v3406_v10 }
 0x1c8   :  { %2931 = vmatprep.subr.bf16.mxu0 %v3407_v11  ;;  %2953 = vmatprep.subr.bf16.mxu1 %v3408_v12 }
 0x1cb   :  { %2932 = vmatpush3.bf16.msra.mxu0 %v3409_v13  ;;  %2954 = vmatpush3.bf16.msra.mxu1 %v3410_v14 }
 0x1cc   :  { %2933 = vmatprep.subr.bf16.mxu0 %v3411_v15  ;;  %2955 = vmatprep.subr.bf16.mxu1 %v3412_v16 }
 0x1cf   :  { %2934 = vmatpush3.bf16.msra.mxu0 %v3413_v17  ;;  %2956 = vmatpush3.bf16.msra.mxu1 %v3414_v18 }
 0x1d0   :  { %2935 = vmatprep.subr.bf16.mxu0 %v3415_v19  ;;  %2957 = vmatprep.subr.bf16.mxu1 %v3416_v20 }
 0x1d3   :  { %2936 = vmatpush3.bf16.msra.mxu0 %v3417_v21  ;;  %2958 = vmatpush3.bf16.msra.mxu1 %v3418_v49 }
 0x1d4   :  { %2937 = vmatprep.subr.bf16.mxu0 %v3419_v22  ;;  %2959 = vmatprep.subr.bf16.mxu1 %v3420_v23 }
 0x1d7   :  { %2938 = vmatpush3.bf16.msra.mxu0 %v3421_v24  ;;  %2960 = vmatpush3.bf16.msra.mxu1 %v3422_v26 }
 0x28d   :  { %v2081_v32 = vpop.f32.mrb[8].mxu0  ;;  %v2245_v33 = vpop.f32.mrb[8].mxu1 }
 0x28e   :  { %v2967_v34 = vadd.f32 %v2081_v32, %v627_v4  ;;  %v2969_v35 = vadd.f32 %v2245_v33, %v635_v29  ;;  %v2083_v36 = vpop.f32.mrb[9].mxu0  ;;  %v2247_v37 = vpop.f32.mrb[9].mxu1 }
 0x28f   :  { %v2968_v43 = vadd.f32 %v2083_v36, %v631_v30  ;;  %v2970_v44 = vadd.f32 %v2247_v37, %v639_v31  ;;  %v2085_v45 = vpop.f32.mrb[10].mxu0  ;;  %v2249_v3 = vpop.f32.mrb[10].mxu1 }
 0x290   :  { %v2252_v39 = vmax.f32 %v2967_v34, 0.0  ;;  %v2254_v46 = vmax.f32 %v2969_v35, 0.0  ;;  %v2086_v47 = vpop.f32.mrb[11].mxu0  ;;  %v2250_v61 = vpop.f32.mrb[11].mxu1 }
 0x291   :  { %v2253_v48 = vmax.f32 %v2968_v43, 0.0  ;;  %v2255_v50 = vmax.f32 %v2970_v44, 0.0 }
 0x292   :  { %v2256_v38 = vpack.c.bf16 %v2252_v39, %v2252_v39  ;;  %v2258_v42 = vpack.c.bf16 %v2254_v46, %v2254_v46 }
 0x293   :  { %v2257_v41 = vpack.c.bf16 %v2253_v48, %v2253_v48  ;;  %v2259_v51 = vpack.c.bf16 %v2255_v50, %v2255_v50 }
 0x295   :  { %2555 = vmatprep.mubr.bf16.mxu0 %v2257_v41  ;;  %2595 = vmatprep.mubr.bf16.mxu1 %v2259_v51 }
 0x296   :  { %2556 = vmatmul.mubr.bf16.vlgmr.msra.gmra.mrb[12].mxu0 %v2256_v38  ;;  %2596 = vmatmul.mubr.bf16.vlgmr.msra.gmra.mrb[12].mxu1 %v2258_v42 }
 0x369   :  { %v2939_v28 = vpop.f32.mrb[12].mxu0  ;;  %v2961_v52 = vpop.f32.mrb[12].mxu1 }
 0x36a   :  { %v2940_v54 = vpop.f32.mrb[13].mxu0  ;;  %v2962_v55 = vpop.f32.mrb[13].mxu1 }
 0x36b   :  { %v2941_v56 = vadd.f32 %v2940_v54, %v2939_v28  ;;  %v2963_v40 = vadd.f32 %v2962_v55, %v2961_v52  ;;  %v2942_v57 = vpop.f32.mrb[14].mxu0  ;;  %v2964_v25 = vpop.f32.mrb[14].mxu1 }
 0x36c   :  { %v2943_v58 = vpop.f32.mrb[15].mxu0  ;;  %v2965_v59 = vpop.f32.mrb[15].mxu1 }
 0x36d   :  { %v2558_v60 = vadd.f32 %v2941_v56, %v2890_v53 }
 0x36f   :  { %v2598_v62 = vadd.f32 %v2963_v40, %v2558_v60 }
 0x371   :  { %3423 = vtanh.f32 %v2598_v62 }
 0x37b   :  { %v3424_v63 = vpop.eup %3423 }
 0x37c   :  { %2604 = vst [vmem:[%s3722_s7] sm:$0xff] %v3424_v63 }
 0x37d   :  { %2609 = vsyncpa [#allocation3], 1 }

</bundles_post_ra>
